<compile_context>
chip_gen: v7x
topology: tpu7x:2x2x1
jax: 0.10.0
libtpu: 0.0.40
codegen_flags: <defaults>
</compile_context>

<pallas_src>
import functools
import re

import jax
import jax.numpy as jnp
from jax.experimental import pallas as pl
from jax.experimental.pallas import tpu as pltpu


def _dtype_min(dtype):
    dtype = jnp.dtype(dtype)
    if jnp.issubdtype(dtype, jnp.floating):
        return float("-inf")
    return int(jnp.iinfo(dtype).min)


def _round_up(x, m):
    return ((x + m - 1) // m) * m


def _tpu_generation():
    """Best-effort TPU generation from device_kind; 0 if unknown."""
    try:
        kind = jax.devices()[0].device_kind
        m = re.search(r"(\d+)", kind)
        if m:
            return int(m.group(1))
    except Exception:
        pass
    return 0


def _global_max_pool1d_kernel(x_ref, o_ref, *, seq_len, tl, min_val, mask_tail):
    k = pl.program_id(1)            # L-tile index (reduction axis, last grid axis)
    n_k = pl.num_programs(1)

    @pl.when(k == 0)
    def _init():
        # o_ref is resident in VMEM across k (index_map ignores k): it is the
        # narrow (TR, 1) accumulator.
        o_ref[...] = jnp.full(o_ref.shape, min_val, dtype=o_ref.dtype)

    def _accumulate(tile):
        partial = jnp.max(tile, axis=-1, keepdims=True).astype(o_ref.dtype)
        o_ref[...] = jnp.maximum(o_ref[...], partial)

    if mask_tail:
        # Hot loop: plain unmasked max on every tile except the last one.
        @pl.when(k < n_k - 1)
        def _hot():
            _accumulate(x_ref[...])

        # Tail only: mask the padded columns with the dtype minimum so
        # unspecified padding can never win the max.
        @pl.when(k == n_k - 1)
        def _tail():
            tile = x_ref[...]
            col = k * tl + jax.lax.broadcasted_iota(jnp.int32, tile.shape, 1)
            tile = jnp.where(col < seq_len, tile,
                             jnp.asarray(min_val, dtype=tile.dtype))
            _accumulate(tile)
    else:
        _accumulate(x_ref[...])


def global_max_pool1d(x: jax.Array, *, block_bytes: int | None = None) -> jax.Array:
    """x: (N, C, L) -> (N, C, 1); max over the last axis."""
    N, C, L = x.shape
    R = N * C
    x2 = x.reshape(R, L)  # free: rows -> sublanes, L -> lanes (rows contiguous in HBM)

    dtype = x.dtype
    itemsize = jnp.dtype(dtype).itemsize
    min_val = _dtype_min(dtype)

    # Per-generation input-block byte target (double-buffered by the pipeline).
    gen = _tpu_generation()
    vmem_limit = None
    if block_bytes is not None:
        target_bytes = int(block_bytes)
    elif gen >= 7:
        target_bytes = 16 << 20           # v7x: amortize 0.35us/step against 3.2 TB/s
        vmem_limit = 48 << 20             # 2x16 MiB input needs > default 32 MiB scoped
    elif gen == 6:
        target_bytes = 8 << 20            # fits 2x8 MiB in v6e's 32 MiB default scoped
    else:
        target_bytes = 4 << 20            # v5e / unknown: 16 MiB default scoped

    # Sublane multiple for the dtype (f32: 8, bf16: 16, int8: 32).
    sub = max(8, 32 // itemsize)

    # ---- Tile selection -----------------------------------------------------
    if L * itemsize * sub <= target_bytes:
        # Full-L blocks: fully contiguous HBM reads, no tail masking.
        TL = L
        tr_cap = max(sub, ((target_bytes // (L * itemsize)) // sub) * sub)
        TR = R if tr_cap >= R else tr_cap
    else:
        # Long L: minimal sublane rows, grow the lane (contiguous) dim.
        TR = R if R <= sub else sub
        tl_cap = max(512, ((target_bytes // (TR * itemsize)) // 128) * 128)
        TL = L if tl_cap >= L else tl_cap

    mask_tail = (L % TL) != 0

    n_r = pl.cdiv(R, TR)
    n_l = pl.cdiv(L, TL)

    # Ensure >= 2 row tiles when it is essentially free (v7x has 2 TensorCores;
    # the extra grid step is negligible once each half-block is >= 1 MiB).
    if n_r == 1 and R > sub:
        half = _round_up(pl.cdiv(R, 2), sub)
        if half < R and half * TL * itemsize >= (1 << 20):
            TR = half
            n_r = pl.cdiv(R, TR)

    kernel = functools.partial(
        _global_max_pool1d_kernel,
        seq_len=L, tl=TL, min_val=min_val, mask_tail=mask_tail)

    cp_kwargs = dict(dimension_semantics=("parallel", "arbitrary"))
    if vmem_limit is not None:
        cp_kwargs["vmem_limit_bytes"] = vmem_limit

    cost = pl.CostEstimate(
        flops=R * L,
        transcendentals=0,
        bytes_accessed=R * L * itemsize + R * itemsize)

    out2 = pl.pallas_call(
        kernel,
        out_shape=jax.ShapeDtypeStruct((R, 1), dtype),
        grid=(n_r, n_l),
        in_specs=[pl.BlockSpec((TR, TL), lambda r, k: (r, k))],
        out_specs=pl.BlockSpec((TR, 1), lambda r, k: (r, 0)),
        compiler_params=pltpu.CompilerParams(**cp_kwargs),
        cost_estimate=cost,
    )(x2)

    return out2.reshape(N, C, 1)


if __name__ == "__main__":
    key = jax.random.PRNGKey(0)

    # Small shapes matching the module's forward: (batch, channels, length).
    N, C, L = 2, 4, 16
    x = jax.random.normal(key, (N, C, L), dtype=jnp.float32)
    out = jax.block_until_ready(global_max_pool1d(x))
    ref = jnp.max(x, axis=2, keepdims=True)
    assert out.shape == (N, C, 1), out.shape
    assert jnp.allclose(out, ref), "mismatch vs reference (small case)"

    # Case with many rows: exercises full-L blocks + >=2 row tiles.
    N2, C2, L2 = 2, 128, 2500
    x2 = jax.random.normal(jax.random.PRNGKey(1), (N2, C2, L2), dtype=jnp.float32)
    out2 = jax.block_until_ready(global_max_pool1d(x2))
    ref2 = jnp.max(x2, axis=2, keepdims=True)
    assert out2.shape == (N2, C2, 1), out2.shape
    assert jnp.allclose(out2, ref2), "mismatch vs reference (row-tiled case)"

    # Forced small block budget: exercises the tiled-L reduction with a masked
    # tail tile (hot path unmasked, only last L tile masked).
    N3, C3, L3 = 2, 4, 2500
    x3 = jax.random.normal(jax.random.PRNGKey(2), (N3, C3, L3), dtype=jnp.float32)
    out3 = jax.block_until_ready(global_max_pool1d(x3, block_bytes=64 * 1024))
    ref3 = jnp.max(x3, axis=2, keepdims=True)
    assert out3.shape == (N3, C3, 1), out3.shape
    assert jnp.allclose(out3, ref3), "mismatch vs reference (masked-tail case)"

    print("KERNEL_OK")
</pallas_src>

<mosaic_0001>
module attributes {stable_mosaic.version = 11 : i64} {
  func.func @_global_max_pool1d_kernel(%arg0: i32, %arg1: i32, %arg2: memref<8x16xf32, #tpu.memory_space<vmem>>, %arg3: memref<8x1xf32, #tpu.memory_space<vmem>>) attributes {dimension_semantics = [#tpu.dimension_semantics<parallel>, #tpu.dimension_semantics<arbitrary>], iteration_bounds = array<i64: 1, 1>, scalar_prefetch = 0 : i64, scratch_operands = 0 : i64, tpu.core_type = #tpu.core_type<tc>, window_params = [{transform_indices = @transform_0, window_bounds = array<i64: 8, 16>}, {transform_indices = @transform_1, window_bounds = array<i64: 8, 1>}]} {
    %c0_i32 = arith.constant 0 : i32
    %0 = arith.cmpi eq, %arg1, %c0_i32 : i32
    %1 = arith.extui %0 : i1 to i32
    %c0_i32_0 = arith.constant 0 : i32
    %2 = arith.cmpi ne, %1, %c0_i32_0 : i32
    scf.if %2 {
      %cst_6 = arith.constant 0xFF800000 : f32
      %9 = vector.broadcast %cst_6 : f32 to vector<8x1xf32>
      %c0_7 = arith.constant 0 : index
      %c0_8 = arith.constant 0 : index
      %10 = vector.load %arg3[%c0_7, %c0_8] : memref<8x1xf32, #tpu.memory_space<vmem>>, vector<8x1xf32>
      tpu.vector_store %arg3[%c0_7, %c0_8], %9 {strides = array<i32>} : memref<8x1xf32, #tpu.memory_space<vmem>>, vector<8x1xf32>,
    } else {
    }
    %c0 = arith.constant 0 : index
    %c0_1 = arith.constant 0 : index
    %3 = vector.load %arg2[%c0, %c0_1] : memref<8x16xf32, #tpu.memory_space<vmem>>, vector<8x16xf32>
    %cst = arith.constant dense<0xFF800000> : vector<8xf32>
    %4 = vector.multi_reduction <maximumf>, %3, %cst [1] : vector<8x16xf32> to vector<8xf32>
    %5 = vector.shape_cast %4 : vector<8xf32> to vector<8x1xf32>
    %c0_2 = arith.constant 0 : index
    %c0_3 = arith.constant 0 : index
    %6 = vector.load %arg3[%c0_2, %c0_3] : memref<8x1xf32, #tpu.memory_space<vmem>>, vector<8x1xf32>
    %7 = arith.maximumf %6, %5 : vector<8x1xf32>
    %c0_4 = arith.constant 0 : index
    %c0_5 = arith.constant 0 : index
    %8 = vector.load %arg3[%c0_4, %c0_5] : memref<8x1xf32, #tpu.memory_space<vmem>>, vector<8x1xf32>
    tpu.vector_store %arg3[%c0_4, %c0_5], %7 {strides = array<i32>} : memref<8x1xf32, #tpu.memory_space<vmem>>, vector<8x1xf32>,
    return
  }
  func.func @transform_0(%arg0: i32, %arg1: i32) -> (i32, i32) {
    %c0_i32 = arith.constant 0 : i32
    return %arg0, %arg1 : i32, i32
  }
  func.func @transform_1(%arg0: i32, %arg1: i32) -> (i32, i32) {
    %c0_i32 = arith.constant 0 : i32
    %c0_i32_0 = arith.constant 0 : i32
    return %arg0, %c0_i32 : i32, i32
  }
}

</mosaic_0001>

<bundles_post_ra>
// kernel: tpu_custom_call.1
= control target key start
LH: loop header
LB: loop body
LE: loop exit
PB: predicated region body
PF: predicated region fallthrough
CT: control target
= control target key end

     0   :  { %6 = vsyncpa [#allocation3], 0  ;;  %s66_s6 = smov [#allocation2]   ;;  %s99_s0 = inlined_call_operand.hbm [shape: f32[8,16], index: 0, kind: input, shape index: {}]   ;;  %s100_s1 = inlined_call_operand.vmem [shape: f32[8,1], index: 1, kind: output, shape index: {}]  }
   0x1   :  { %s13_s7 = sshll.u32 %s66_s6, 4  ;;  %s42_s10 = scalar_lea.hbm %s99_s0, 128  ;;  %s14_s7 = int_to_ptr.vmem [resolvable:$true] %s13_s7 }
   0x2   :  { %p43_p0 = scmp.ne.s32.totalorder %s99_s0, %s42_s10  ;;  %p46_p1 = scmp.lt.u32.totalorder %s42_s10, %s99_s0 }
   0x4   :  { %p48_p2 = pnand %p46_p1, %p43_p0 }
   0x6   :  { %51 = shalt.err (!%p48_p2)
}
   0x7   :  { %s52_s15 = scalar_lea.vmem %s14_s7, 128  ;;  %p57_p4 = scmp.lt.s32.totalorder %s14_s7, %s14_s7 }
   0x8   :  { %p53_p3 = scmp.ne.s32.totalorder %s14_s7, %s52_s15  ;;  %p58_p5 = scmp.lt.s32.totalorder %s52_s15, %s52_s15 }
   0xa   :  { %p59_p6 = por %p58_p5, %p57_p4 }
   0xc   :  { %p60_p7 = pnand %p59_p6, %p53_p3 }
   0xe   :  { %63 = shalt.err (!%p60_p7)
}
   0xf   :  { %16 = dma.hbm_to_vmem [thread:$0]  %s99_s0, 128, %s14_s7, [#allocation3]  }
  0x10   :  { %64 = dma.done.wait [#allocation3], 128  }
  0x11   :  { %65 = vsyncadd [#allocation3], 4294967168  ;;  %vm24_vm0 = vcmask 7168   ;;  %v67_v0 = vmov -inf   ;;  %vm27_vm1 = vcmask 130048   ;;  %v26_v1 = vld [vmem:[#allocation2] sm:$0xff] }
  0x12   :  { %25 = vst.msk [vmem:[%s100_s1] sm:$0xff] %vm24_vm0, %v67_v0  ;;  %v28_v2 = vsel %vm27_vm1, %v26_v1, -inf }
  0x13   :  { %29 = vmax.xlane.f32.xlu0 %v28_v2 }
  0x19   :  { %v31_v3 = vld [vmem:[%s100_s1] sm:$0xff] }
  0xa0   :  { %v30_v4 = vpop.xlane.xlu0 %29 }
  0xa1   :  { %v32_v5 = vmax.f32 %v31_v3, %v30_v4 }
  0xa3   :  { %34 = vst.msk [vmem:[%s100_s1] sm:$0xff] %vm24_vm0, %v32_v5 }
  0xa4   :  { %39 = vsyncpa [#allocation3], 1 }

</bundles_post_ra>
